<compile_context>
chip_gen: v7x
topology: tpu7x:2x2x1
jax: 0.10.0
libtpu: 0.0.40
codegen_flags: <defaults>
</compile_context>

<pallas_src>
import functools

import jax
import jax.numpy as jnp
from jax.experimental import pallas as pl
from jax.experimental.pallas import tpu as pltpu


def _round_up(x, m):
    return ((x + m - 1) // m) * m


# ----------------------------- fused Pallas kernel ----------------------------

def _make_fused_mlp_kernel(relu_flags):
    """Kernel factory: one fused forward pass over all layers (unrolled at trace time)."""
    n_layers = len(relu_flags)

    def kernel(*refs):
        x_ref = refs[0]
        o_ref = refs[-1]
        p = refs[1:-1]                      # (w0, b0, w1, b1, ..., wL, bL)
        h = x_ref[...].astype(jnp.float32)
        for l in range(n_layers):
            w = p[2 * l][...]
            b = p[2 * l + 1][...]
            # MXU matmul with f32 accumulation, then VPU bias add (+ ReLU).
            h = jnp.dot(h, w, preferred_element_type=jnp.float32) + b
            if relu_flags[l]:
                h = jnp.maximum(h, 0.0)
        o_ref[...] = h.astype(o_ref.dtype)

    return kernel


# ----------------------------- wrapper -----------------------------------------

@functools.partial(jax.jit, static_argnames=("relu_flags", "out_dim", "tm"))
def _mlp_forward_fused(x, flat_params, *, relu_flags, out_dim, tm):
    B, Din = x.shape
    dout_pad = flat_params[-1].shape[-1]    # lane-dense (padded) final width

    # Pad the batch so every grid step works on a full, aligned tile
    # (handles B % tm != 0 correctly instead of dropping the remainder).
    B_pad = _round_up(max(B, tm), tm)
    if B_pad != B:
        x = jnp.pad(x, ((0, B_pad - B), (0, 0)))
    grid = (B_pad // tm,)

    in_specs = [pl.BlockSpec((tm, Din), lambda i: (i, 0))]
    for p_arr in flat_params:
        # Whole parameter array resident in VMEM for every grid step (constant index_map
        # => fetched once, reused across the batch grid).
        in_specs.append(pl.BlockSpec(p_arr.shape, lambda i: (0, 0)))

    # Advisory cost estimate: 2*M*K*N flops per matmul, all operands touched once.
    flops = 0
    bytes_accessed = x.size * 4 + B_pad * dout_pad * 4
    k = Din
    for l in range(len(relu_flags)):
        n = flat_params[2 * l].shape[-1]
        flops += 2 * B_pad * k * n
        bytes_accessed += (flat_params[2 * l].size + flat_params[2 * l + 1].size) * 4
        k = n
    cost = pl.CostEstimate(flops=flops, transcendentals=0, bytes_accessed=bytes_accessed)

    out = pl.pallas_call(
        _make_fused_mlp_kernel(relu_flags),
        out_shape=jax.ShapeDtypeStruct((B_pad, dout_pad), jnp.float32),
        grid_spec=pltpu.PrefetchScalarGridSpec(
            num_scalar_prefetch=0,
            grid=grid,
            in_specs=in_specs,
            out_specs=pl.BlockSpec((tm, dout_pad), lambda i: (i, 0)),
        ),
        compiler_params=pltpu.CompilerParams(
            dimension_semantics=("parallel",),   # megacore-shardable batch axis
            vmem_limit_bytes=32 * 1024 * 1024,   # safe on v5e/v6e/v7x for these tiles
        ),
        cost_estimate=cost,
    )(x, *flat_params)

    # Strip batch padding and the lane padding of the final layer.
    return out[:B, :out_dim]


def mlp_forward(x, params, *, tm=None):
    """Non-jitted entry point: extracts arrays + static structure, then calls the jitted fn."""
    B, Din = x.shape
    flat = params["flat"]
    if tm is None:
        # Choose the biggest batch tile that (with double-buffered x/out tiles plus all
        # resident weights) stays well inside the 32 MiB scoped-VMEM budget, capped at 512.
        weight_bytes = sum(int(p.size) * 4 for p in flat)
        dout_pad = int(flat[-1].shape[-1])
        widest = max([Din, dout_pad] + [int(p.shape[-1]) for p in flat[::2]])
        budget = 24 * 1024 * 1024 - weight_bytes          # leave headroom below 32 MiB
        per_row = 4 * (Din + dout_pad) * 2 + 4 * widest   # dbl-buffered I/O + live vregs
        tm_cap = max(8, budget // max(per_row, 1))
        tm = min(512, tm_cap, _round_up(B, 8))
        tm = max(8, (tm // 8) * 8)
    return _mlp_forward_fused(
        x,
        flat,
        relu_flags=params["relu_flags"],
        out_dim=params["out_dim"],
        tm=tm,
    )


# ----------------------------- parameter init ---------------------------------

def init_mlp_params(key, input_dim, output_dims, output_layer=True, eps=1e-5):
    """Builds PyTorch-shaped parameters, folds eval-mode BN into the Linears, and pads
    the final layer to a lane-dense width. Returns both the kernel-ready flat params and
    the raw (unfolded) parameters for the pure-JAX reference."""
    raw = []
    flat = []
    relu_flags = []
    din = input_dim
    for dout in output_dims:
        key, kw, kb, kg, kbeta, km, kv = jax.random.split(key, 7)
        bound = 1.0 / (din ** 0.5)
        w = jax.random.uniform(kw, (din, dout), jnp.float32, -bound, bound)
        b = jax.random.uniform(kb, (1, dout), jnp.float32, -bound, bound)
        gamma = jax.random.uniform(kg, (1, dout), jnp.float32, 0.5, 1.5)
        beta = jax.random.uniform(kbeta, (1, dout), jnp.float32, -0.5, 0.5)
        mean = jax.random.normal(km, (1, dout), jnp.float32) * 0.1
        var = jax.random.uniform(kv, (1, dout), jnp.float32, 0.5, 1.5)
        raw.append(dict(w=w, b=b, gamma=gamma, beta=beta, mean=mean, var=var, relu=True))
        # Fold eval-mode BatchNorm1d into the Linear.
        scale = gamma / jnp.sqrt(var + eps)
        shift = beta - mean * scale
        flat += [w * scale, b * scale + shift]
        relu_flags.append(True)
        din = dout
    if output_layer:
        key, kw, kb = jax.random.split(key, 3)
        bound = 1.0 / (din ** 0.5)
        w = jax.random.uniform(kw, (din, 1), jnp.float32, -bound, bound)
        b = jax.random.uniform(kb, (1, 1), jnp.float32, -bound, bound)
        raw.append(dict(w=w, b=b, relu=False))
        flat += [w, b]
        relu_flags.append(False)
        out_dim = 1
    else:
        out_dim = din

    # Lane-dense final layer: pad last W/b columns (zeros) up to a multiple of 128 so
    # the kernel's output stores are full-width and unmasked.
    dout_last = flat[-1].shape[-1]
    dout_pad = _round_up(dout_last, 128)
    if dout_pad != dout_last:
        flat[-2] = jnp.pad(flat[-2], ((0, 0), (0, dout_pad - dout_last)))
        flat[-1] = jnp.pad(flat[-1], ((0, 0), (0, dout_pad - dout_last)))

    return dict(flat=tuple(flat), relu_flags=tuple(relu_flags), out_dim=out_dim, raw=raw)


# ----------------------------- pure-JAX reference -------------------------------

def mlp_forward_ref(x, params, eps=1e-5):
    h = x
    for layer in params["raw"]:
        h = h @ layer["w"] + layer["b"]
        if "gamma" in layer:
            h = (h - layer["mean"]) / jnp.sqrt(layer["var"] + eps) * layer["gamma"] + layer["beta"]
        if layer["relu"]:
            h = jnp.maximum(h, 0.0)
    return h


# ----------------------------- main --------------------------------------------

if __name__ == "__main__":
    key = jax.random.PRNGKey(0)
    kx, kp = jax.random.split(key)

    batch = 16
    input_dim = 32
    output_dims = (64, 32)
    dropout = 0.0  # eval mode -> identity regardless

    x = jax.random.normal(kx, (batch, input_dim), jnp.float32)
    params = init_mlp_params(kp, input_dim, output_dims, output_layer=True)

    out = mlp_forward(x, params)
    out = jax.block_until_ready(out)

    ref = mlp_forward_ref(x, params)
    assert out.shape == (batch, 1), out.shape
    assert jnp.allclose(out, ref, atol=1e-3, rtol=1e-3), (
        "mismatch vs reference, max abs diff = %e" % float(jnp.max(jnp.abs(out - ref)))
    )

    # Also exercise a non-tile-multiple batch to validate the padding path.
    x2 = jax.random.normal(kx, (13, input_dim), jnp.float32)
    out2 = jax.block_until_ready(mlp_forward(x2, params, tm=8))
    ref2 = mlp_forward_ref(x2, params)
    assert out2.shape == (13, 1), out2.shape
    assert jnp.allclose(out2, ref2, atol=1e-3, rtol=1e-3)

    print("KERNEL_OK")
</pallas_src>

<mosaic_0001>
module attributes {stable_mosaic.version = 11 : i64} {
  func.func @kernel(%arg0: i32, %arg1: memref<16x32xf32, #tpu.memory_space<vmem>>, %arg2: memref<32x64xf32, #tpu.memory_space<vmem>>, %arg3: memref<1x64xf32, #tpu.memory_space<vmem>>, %arg4: memref<64x32xf32, #tpu.memory_space<vmem>>, %arg5: memref<1x32xf32, #tpu.memory_space<vmem>>, %arg6: memref<32x128xf32, #tpu.memory_space<vmem>>, %arg7: memref<1x128xf32, #tpu.memory_space<vmem>>, %arg8: memref<16x128xf32, #tpu.memory_space<vmem>>) attributes {dimension_semantics = [#tpu.dimension_semantics<parallel>], iteration_bounds = array<i64: 1>, scalar_prefetch = 0 : i64, scratch_operands = 0 : i64, tpu.core_type = #tpu.core_type<tc>, window_params = [{transform_indices = @transform_0, window_bounds = array<i64: 16, 32>}, {pipeline_mode = #tpu.pipeline_mode<synchronous>, transform_indices = @transform_1, window_bounds = array<i64: 32, 64>}, {pipeline_mode = #tpu.pipeline_mode<synchronous>, transform_indices = @transform_2, window_bounds = array<i64: 1, 64>}, {pipeline_mode = #tpu.pipeline_mode<synchronous>, transform_indices = @transform_3, window_bounds = array<i64: 64, 32>}, {pipeline_mode = #tpu.pipeline_mode<synchronous>, transform_indices = @transform_4, window_bounds = array<i64: 1, 32>}, {pipeline_mode = #tpu.pipeline_mode<synchronous>, transform_indices = @transform_5, window_bounds = array<i64: 32, 128>}, {pipeline_mode = #tpu.pipeline_mode<synchronous>, transform_indices = @transform_6, window_bounds = array<i64: 1, 128>}, {transform_indices = @transform_7, window_bounds = array<i64: 16, 128>}]} {
    %c0 = arith.constant 0 : index
    %c0_0 = arith.constant 0 : index
    %0 = vector.load %arg1[%c0, %c0_0] : memref<16x32xf32, #tpu.memory_space<vmem>>, vector<16x32xf32>
    %c0_1 = arith.constant 0 : index
    %c0_2 = arith.constant 0 : index
    %1 = vector.load %arg2[%c0_1, %c0_2] : memref<32x64xf32, #tpu.memory_space<vmem>>, vector<32x64xf32>
    %c0_3 = arith.constant 0 : index
    %c0_4 = arith.constant 0 : index
    %2 = vector.load %arg3[%c0_3, %c0_4] : memref<1x64xf32, #tpu.memory_space<vmem>>, vector<1x64xf32>
    %cst = arith.constant dense<0.000000e+00> : vector<16x64xf32>
    %3 = tpu.matmul %0, %1, %cst {dimension_numbers = #tpu.dot_dimension_numbers<[1], [0], [0], [1], [0, 0, 1, 1], [], []>} : vector<16x32xf32>, vector<32x64xf32>, vector<16x64xf32> -> vector<16x64xf32>
    %4 = vector.broadcast %2 : vector<1x64xf32> to vector<16x64xf32>
    %5 = arith.addf %3, %4 : vector<16x64xf32>
    %cst_5 = arith.constant 0.000000e+00 : f32
    %6 = vector.broadcast %cst_5 : f32 to vector<16x64xf32>
    %7 = arith.maximumf %5, %6 : vector<16x64xf32>
    %c0_6 = arith.constant 0 : index
    %c0_7 = arith.constant 0 : index
    %8 = vector.load %arg4[%c0_6, %c0_7] : memref<64x32xf32, #tpu.memory_space<vmem>>, vector<64x32xf32>
    %c0_8 = arith.constant 0 : index
    %c0_9 = arith.constant 0 : index
    %9 = vector.load %arg5[%c0_8, %c0_9] : memref<1x32xf32, #tpu.memory_space<vmem>>, vector<1x32xf32>
    %cst_10 = arith.constant dense<0.000000e+00> : vector<16x32xf32>
    %10 = tpu.matmul %7, %8, %cst_10 {dimension_numbers = #tpu.dot_dimension_numbers<[1], [0], [0], [1], [0, 0, 1, 1], [], []>} : vector<16x64xf32>, vector<64x32xf32>, vector<16x32xf32> -> vector<16x32xf32>
    %11 = vector.broadcast %9 : vector<1x32xf32> to vector<16x32xf32>
    %12 = arith.addf %10, %11 : vector<16x32xf32>
    %cst_11 = arith.constant 0.000000e+00 : f32
    %13 = vector.broadcast %cst_11 : f32 to vector<16x32xf32>
    %14 = arith.maximumf %12, %13 : vector<16x32xf32>
    %c0_12 = arith.constant 0 : index
    %c0_13 = arith.constant 0 : index
    %15 = vector.load %arg6[%c0_12, %c0_13] : memref<32x128xf32, #tpu.memory_space<vmem>>, vector<32x128xf32>
    %c0_14 = arith.constant 0 : index
    %c0_15 = arith.constant 0 : index
    %16 = vector.load %arg7[%c0_14, %c0_15] : memref<1x128xf32, #tpu.memory_space<vmem>>, vector<1x128xf32>
    %cst_16 = arith.constant dense<0.000000e+00> : vector<16x128xf32>
    %17 = tpu.matmul %14, %15, %cst_16 {dimension_numbers = #tpu.dot_dimension_numbers<[1], [0], [0], [1], [0, 0, 1, 1], [], []>} : vector<16x32xf32>, vector<32x128xf32>, vector<16x128xf32> -> vector<16x128xf32>
    %18 = vector.broadcast %16 : vector<1x128xf32> to vector<16x128xf32>
    %19 = arith.addf %17, %18 : vector<16x128xf32>
    %c0_17 = arith.constant 0 : index
    %c0_18 = arith.constant 0 : index
    %20 = vector.load %arg8[%c0_17, %c0_18] : memref<16x128xf32, #tpu.memory_space<vmem>>, vector<16x128xf32>
    tpu.vector_store %arg8[%c0_17, %c0_18], %19 {strides = array<i32>} : memref<16x128xf32, #tpu.memory_space<vmem>>, vector<16x128xf32>,
    return
  }
  func.func @transform_0(%arg0: i32) -> (i32, i32) {
    %c0_i32 = arith.constant 0 : i32
    %c0_i32_0 = arith.constant 0 : i32
    return %arg0, %c0_i32 : i32, i32
  }
  func.func @transform_1(%arg0: i32) -> (i32, i32) {
    %c0_i32 = arith.constant 0 : i32
    %c0_i32_0 = arith.constant 0 : i32
    %c0_i32_1 = arith.constant 0 : i32
    return %c0_i32, %c0_i32_0 : i32, i32
  }
  func.func @transform_2(%arg0: i32) -> (i32, i32) {
    %c0_i32 = arith.constant 0 : i32
    %c0_i32_0 = arith.constant 0 : i32
    %c0_i32_1 = arith.constant 0 : i32
    return %c0_i32, %c0_i32_0 : i32, i32
  }
  func.func @transform_3(%arg0: i32) -> (i32, i32) {
    %c0_i32 = arith.constant 0 : i32
    %c0_i32_0 = arith.constant 0 : i32
    %c0_i32_1 = arith.constant 0 : i32
    return %c0_i32, %c0_i32_0 : i32, i32
  }
  func.func @transform_4(%arg0: i32) -> (i32, i32) {
    %c0_i32 = arith.constant 0 : i32
    %c0_i32_0 = arith.constant 0 : i32
    %c0_i32_1 = arith.constant 0 : i32
    return %c0_i32, %c0_i32_0 : i32, i32
  }
  func.func @transform_5(%arg0: i32) -> (i32, i32) {
    %c0_i32 = arith.constant 0 : i32
    %c0_i32_0 = arith.constant 0 : i32
    %c0_i32_1 = arith.constant 0 : i32
    return %c0_i32, %c0_i32_0 : i32, i32
  }
  func.func @transform_6(%arg0: i32) -> (i32, i32) {
    %c0_i32 = arith.constant 0 : i32
    %c0_i32_0 = arith.constant 0 : i32
    %c0_i32_1 = arith.constant 0 : i32
    return %c0_i32, %c0_i32_0 : i32, i32
  }
  func.func @transform_7(%arg0: i32) -> (i32, i32) {
    %c0_i32 = arith.constant 0 : i32
    %c0_i32_0 = arith.constant 0 : i32
    return %arg0, %c0_i32 : i32, i32
  }
}

</mosaic_0001>

<bundles_post_ra>
// kernel: _mlp_forward_fused.1
= control target key start
LH: loop header
LB: loop body
LE: loop exit
PB: predicated region body
PF: predicated region fallthrough
CT: control target
= control target key end

     0   :  { %vm39_vm0 = vcmask 261120   ;;  %vm138_vm1 = vcmask 523264   ;;  %s537_s1 = inlined_call_operand.vmem [shape: f32[32,64], index: 1, kind: input, shape index: {}]   ;;  %s538_s0 = inlined_call_operand.vmem [shape: f32[16,32], index: 0, kind: input, shape index: {}]   ;;  %s539_s3 = inlined_call_operand.vmem [shape: f32[64,32], index: 3, kind: input, shape index: {}]   ;;  %s540_s5 = inlined_call_operand.vmem [shape: f32[32,128], index: 5, kind: input, shape index: {}]   ;;  %s541_s2 = inlined_call_operand.vmem [shape: f32[1,64], index: 2, kind: input, shape index: {}]   ;;  %s542_s4 = inlined_call_operand.vmem [shape: f32[1,32], index: 4, kind: input, shape index: {}]   ;;  %s543_s6 = inlined_call_operand.vmem [shape: f32[1,128], index: 6, kind: input, shape index: {}]   ;;  %s544_s7 = inlined_call_operand.vmem [shape: f32[16,128], index: 7, kind: output, shape index: {}]  }
   0x1   :  { %v28_v0 = vld [vmem:[%s537_s1] sm:$0xff]  ;;  %v29_v1 = vld [vmem:[%s537_s1 + $0x8] sm:$0xff]  ;;  %v30_v2 = vld [vmem:[%s537_s1 + $0x10] sm:$0xff] }
   0x2   :  { %v392_v3 = vpack.c.bf16 %v29_v1, %v28_v0  ;;  %v31_v4 = vld [vmem:[%s537_s1 + $0x18] sm:$0xff]  ;;  %v26_v5 = vld [vmem:[%s538_s0] sm:$0xff]  ;;  %v124_v8 = vld [vmem:[%s539_s3 + $0x8] sm:$0xff] }
   0x3   :  { %v396_v6 = vpack.c.bf16 %v31_v4, %v30_v2  ;;  %359 = vmatprep.mubr.msk.f32.mxu0 %vm39_vm0, %v26_v5  ;;  %v123_v7 = vld [vmem:[%s539_s3] sm:$0xff]  ;;  %v125_v9 = vld [vmem:[%s539_s3 + $0x10] sm:$0xff]  ;;  %v126_v11 = vld [vmem:[%s539_s3 + $0x18] sm:$0xff] }
   0x4   :  { %393 = vmatprep.subr.bf16.mxu0 %v392_v3  ;;  %v400_v10 = vpack.c.bf16 %v124_v8, %v123_v7  ;;  %v404_v12 = vpack.c.bf16 %v126_v11, %v125_v9  ;;  %v127_v13 = vld [vmem:[%s539_s3 + $0x20] sm:$0xff]  ;;  %v128_v14 = vld [vmem:[%s539_s3 + $0x28] sm:$0xff]  ;;  %v129_v17 = vld [vmem:[%s539_s3 + $0x30] sm:$0xff] }
   0x5   :  { %395 = vmatpush3.bf16.msra.mxu0 %v392_v3  ;;  %v408_v15 = vpack.c.bf16 %v128_v14, %v127_v13  ;;  %v27_v16 = vld [vmem:[%s538_s0 + $0x8] sm:$0xff]  ;;  %v130_v18 = vld [vmem:[%s539_s3 + $0x38] sm:$0xff]  ;;  %v222_v20 = vld [vmem:[%s540_s5] sm:$0xff] }
   0x6   :  { %397 = vmatprep.subr.bf16.mxu0 %v396_v6  ;;  %401 = vmatprep.subr.bf16.mxu1 %v400_v10  ;;  %v412_v19 = vpack.c.bf16 %v130_v18, %v129_v17  ;;  %v223_v21 = vld [vmem:[%s540_s5 + $0x8] sm:$0xff]  ;;  %v320_v23 = vld [vmem:[%s541_s2] ss:$0 sm:$0xff]  ;;  %v224_v30 = vld [vmem:[%s540_s5 + $0x10] sm:$0xff] }
   0x7   :  { %403 = vmatpush3.bf16.msra.mxu1 %v400_v10  ;;  %v416_v22 = vpack.c.bf16 %v223_v21, %v222_v20  ;;  %v225_v31 = vld [vmem:[%s540_s5 + $0x18] sm:$0xff]  ;;  %v323_v33 = vld [vmem:[%s542_s4] ss:$0 sm:$0xff] }
   0x8   :  { %405 = vmatprep.subr.bf16.mxu1 %v404_v12  ;;  %v420_v32 = vpack.c.bf16 %v225_v31, %v224_v30  ;;  %v326_v40 = vld [vmem:[%s543_s6] ss:$0 sm:$0xff] }
   0x9   :  { %399 = vmatpush3.bf16.msra.mxu0 %v396_v6 }
   0xa   :  { %417 = vmatprep.subr.bf16.mxu0 %v416_v22 }
   0xb   :  { %407 = vmatpush3.bf16.msra.mxu1 %v404_v12 }
   0xc   :  { %360 = vmatmul.mubr.msk.f32.vlgmr.msra.gmra.mrb[0].mxu0 %vm39_vm0, %v27_v16  ;;  %409 = vmatprep.subr.bf16.mxu1 %v408_v15 }
   0xd   :  { %419 = vmatpush3.bf16.msra.mxu0 %v416_v22 }
   0xe   :  { %421 = vmatprep.subr.bf16.mxu0 %v420_v32 }
   0xf   :  { %411 = vmatpush3.bf16.msra.mxu1 %v408_v15 }
  0x10   :  { %413 = vmatprep.subr.bf16.mxu1 %v412_v19 }
  0x11   :  { %423 = vmatpush3.bf16.msra.mxu0 %v420_v32 }
  0x13   :  { %415 = vmatpush3.bf16.msra.mxu1 %v412_v19 }
  0xdf   :  { %v361_v24 = vpop.f32.mrb[0].mxu0 }
  0xe0   :  { %v118_v25 = vadd.f32 %v361_v24, %v320_v23  ;;  %v112_v26 = vpop.f32.mrb[1].mxu0 }
  0xe1   :  { %v113_v27 = vadd.f32 %v320_v23, %v112_v26 }
  0xe2   :  { %v122_v29 = vmax.f32 %v118_v25, 0.0 }
  0xe3   :  { %v121_v28 = vmax.f32 %v113_v27, 0.0 }
  0xe5   :  { %378 = vmatprep.mubr.msk.f32.mxu1 %vm138_vm1, %v121_v28 }
  0xe6   :  { %379 = vmatmul.mubr.msk.f32.vlgmr.msra.gmra.mrb[0].mxu1 %vm138_vm1, %v122_v29 }
 0x1b9   :  { %v380_v34 = vpop.f32.mrb[0].mxu1 }
 0x1ba   :  { %v217_v35 = vadd.f32 %v380_v34, %v323_v33  ;;  %v211_v36 = vpop.f32.mrb[1].mxu1 }
 0x1bb   :  { %v212_v37 = vadd.f32 %v323_v33, %v211_v36 }
 0x1bc   :  { %v221_v39 = vmax.f32 %v217_v35, 0.0 }
 0x1bd   :  { %v220_v38 = vmax.f32 %v212_v37, 0.0 }
 0x1bf   :  { %389 = vmatprep.mubr.msk.f32.mxu0 %vm39_vm0, %v220_v38 }
 0x1c0   :  { %390 = vmatmul.mubr.msk.f32.vlgmr.msra.gmra.mrb[2].mxu0 %vm39_vm0, %v221_v39 }
 0x293   :  { %v391_v41 = vpop.f32.mrb[2].mxu0 }
 0x294   :  { %v311_v42 = vadd.f32 %v391_v41, %v326_v40  ;;  %v305_v43 = vpop.f32.mrb[3].mxu0 }
 0x295   :  { %v306_v44 = vadd.f32 %v326_v40, %v305_v43 }
 0x296   :  { %315 = vst [vmem:[%s544_s7 + $0x8] sm:$0xff] %v311_v42 }
 0x297   :  { %314 = vst [vmem:[%s544_s7] sm:$0xff] %v306_v44 }

</bundles_post_ra>
